<compile_context>
chip_gen: v6e
topology: v6e:2x2x1
jax: 0.10.0
libtpu: 0.0.40
codegen_flags: <defaults>
</compile_context>

<pallas_src>
import functools
import math

import jax
import jax.numpy as jnp
from jax import lax
from jax.experimental import pallas as pl
from jax.experimental.pallas import tpu as pltpu

_MASK_VALUE = -1e9  # matches torch masked_fill(mask == 0, -1e9)


def _online_softmax_update(scores, v_ref, o_ref, m_scr, l_scr, acc_scr):
    """Online-softmax accumulation over the kv grid axis (axis 2)."""
    kv_i = pl.program_id(2)

    @pl.when(kv_i == 0)
    def _():
        m_scr[...] = jnp.full_like(m_scr, -jnp.inf)
        l_scr[...] = jnp.zeros_like(l_scr)
        acc_scr[...] = jnp.zeros_like(acc_scr)

    m_prev = m_scr[...]                                           # [TQ, 1] f32
    m_new = jnp.maximum(m_prev, jnp.max(scores, axis=-1, keepdims=True))
    alpha = jnp.exp(m_prev - m_new)
    p = jnp.exp(scores - m_new)                                   # [TQ, TK] f32
    l_scr[...] = alpha * l_scr[...] + jnp.sum(p, axis=-1, keepdims=True)
    acc_scr[...] = alpha * acc_scr[...] + jnp.dot(
        p.astype(v_ref.dtype), v_ref[...], preferred_element_type=jnp.float32)
    m_scr[...] = m_new

    @pl.when(kv_i == pl.num_programs(2) - 1)
    def _():
        # Exact f32 reciprocal of a [TQ, 1] vector: negligible cost, full accuracy.
        inv_l = 1.0 / l_scr[...]
        o_ref[...] = (acc_scr[...] * inv_l).astype(o_ref.dtype)


def _scores(q_ref, k_ref, scale):
    # Fold 1/sqrt(D) into the small [TQ, D] q tile (cheaper than scaling [TQ, TK]).
    q = q_ref[...] * jnp.asarray(scale, dtype=q_ref.dtype)
    # Contract the last dim of both operands: no explicit K transpose.
    return lax.dot_general(
        q, k_ref[...],
        dimension_numbers=(((1,), (1,)), ((), ())),
        preferred_element_type=jnp.float32,
    )


def _attn_kernel(q_ref, k_ref, v_ref, o_ref, m_scr, l_scr, acc_scr, *, scale):
    scores = _scores(q_ref, k_ref, scale)
    _online_softmax_update(scores, v_ref, o_ref, m_scr, l_scr, acc_scr)


def _attn_kernel_masked(q_ref, k_ref, v_ref, mask_ref, o_ref,
                        m_scr, l_scr, acc_scr, *, scale):
    scores = _scores(q_ref, k_ref, scale)
    # mask_ref is [TQ, TK] or [1, TK] int8; 0 => masked (matches masked_fill).
    scores = jnp.where(mask_ref[...] == 0, jnp.float32(_MASK_VALUE), scores)
    _online_softmax_update(scores, v_ref, o_ref, m_scr, l_scr, acc_scr)


def _pick_tile(s):
    for t in (256, 128):
        if s % t == 0:
            return t
    return s  # small / odd S: one full-extent tile (block == full dim is legal)


def self_attention(query, key, value, mask=None):
    """Pallas scaled-dot-product attention.

    query/key/value: [B, H, S, D].
    mask (optional): any shape broadcastable to [B, H, S, S] along the first
    three dims (e.g. [B, H, S, S] or a BERT padding mask [B, 1, 1, S]);
    entries equal to 0 are masked with -1e9 (as in torch masked_fill).
    Returns [B, H, S, D] in query's dtype.
    """
    B, H, S, D = query.shape
    scale = 1.0 / math.sqrt(D)

    tq = _pick_tile(S)
    tk = _pick_tile(S)
    BH = B * H

    q3 = query.reshape(BH, S, D)
    k3 = key.reshape(BH, S, D)
    v3 = value.reshape(BH, S, D)

    grid = (BH, S // tq, S // tk)

    q_spec = pl.BlockSpec((None, tq, D), lambda bh, qi, ki: (bh, qi, 0))
    k_spec = pl.BlockSpec((None, tk, D), lambda bh, qi, ki: (bh, ki, 0))
    v_spec = pl.BlockSpec((None, tk, D), lambda bh, qi, ki: (bh, ki, 0))
    o_spec = pl.BlockSpec((None, tq, D), lambda bh, qi, ki: (bh, qi, 0))

    scratch = [
        pltpu.VMEM((tq, 1), jnp.float32),   # running max m
        pltpu.VMEM((tq, 1), jnp.float32),   # running denom l
        pltpu.VMEM((tq, D), jnp.float32),   # output accumulator
    ]

    if mask is None:
        kernel = functools.partial(_attn_kernel, scale=scale)
        in_specs = [q_spec, k_spec, v_spec]
        args = (q3, k3, v3)
    else:
        if mask.ndim != 4:
            mask = mask.reshape((1,) * (4 - mask.ndim) + tuple(mask.shape))
        Bm, Hm, Qm, Km = mask.shape
        assert Km == S and Qm in (1, S) and Bm in (1, B) and Hm in (1, H), (
            f"mask shape {mask.shape} not broadcastable to {(B, H, S, S)}")
        mask_i8 = (mask != 0).astype(jnp.int8)   # 4x less HBM than int32
        mq = tq if Qm == S else 1

        def mask_index(bh, qi, ki):
            b_idx = (bh // H) if Bm == B else 0
            h_idx = (bh % H) if Hm == H else 0
            q_idx = qi if Qm == S else 0
            return (b_idx, h_idx, q_idx, ki)

        m_spec = pl.BlockSpec((None, None, mq, tk), mask_index)
        kernel = functools.partial(_attn_kernel_masked, scale=scale)
        in_specs = [q_spec, k_spec, v_spec, m_spec]
        args = (q3, k3, v3, mask_i8)

    out = pl.pallas_call(
        kernel,
        out_shape=jax.ShapeDtypeStruct((BH, S, D), query.dtype),
        grid_spec=pltpu.PrefetchScalarGridSpec(
            num_scalar_prefetch=0,
            grid=grid,
            in_specs=in_specs,
            out_specs=o_spec,
            scratch_shapes=scratch,
        ),
        compiler_params=pltpu.CompilerParams(
            dimension_semantics=("parallel", "parallel", "arbitrary"),
            vmem_limit_bytes=32 * 1024 * 1024,
        ),
    )(*args)

    return out.reshape(B, H, S, D)


def _reference(query, key, value, mask=None):
    scores = jnp.einsum("bhqd,bhkd->bhqk", query, key) / math.sqrt(query.shape[-1])
    if mask is not None:
        scores = jnp.where(mask == 0, _MASK_VALUE, scores)
    prob = jax.nn.softmax(scores, axis=-1)
    return jnp.einsum("bhqk,bhkd->bhqd", prob, value)


if __name__ == "__main__":
    B, H, S, D = 2, 2, 8, 32
    key0 = jax.random.PRNGKey(0)
    kq, kk, kv, km = jax.random.split(key0, 4)

    q = jax.random.normal(kq, (B, H, S, D), dtype=jnp.float32)
    k = jax.random.normal(kk, (B, H, S, D), dtype=jnp.float32)
    v = jax.random.normal(kv, (B, H, S, D), dtype=jnp.float32)
    full_mask = (jax.random.uniform(km, (B, H, S, S)) > 0.2).astype(jnp.int32)
    pad_mask = (jax.random.uniform(km, (B, 1, 1, S)) > 0.2).astype(jnp.int32)

    # Tolerance: f32 matmuls on TPU go through the MXU with default precision
    # (bf16 passes), so the kernel and the differently-ordered reference einsums
    # legitimately differ at the ~1e-2 level for O(1) values. Logic errors would
    # be O(1), so this still catches real bugs.
    TOL = dict(atol=2e-2, rtol=2e-2)

    ok = True

    # no-mask path
    out = jax.block_until_ready(self_attention(q, k, v))
    ref = _reference(q, k, v)
    ok &= bool(jnp.allclose(out, ref, **TOL))

    # full [B, H, S, S] score-mask path
    out_m = jax.block_until_ready(self_attention(q, k, v, full_mask))
    ref_m = _reference(q, k, v, full_mask)
    ok &= bool(jnp.allclose(out_m, ref_m, **TOL))

    # broadcast padding-mask path [B, 1, 1, S]
    out_p = jax.block_until_ready(self_attention(q, k, v, pad_mask))
    ref_p = _reference(q, k, v, pad_mask)
    ok &= bool(jnp.allclose(out_p, ref_p, **TOL))

    assert ok, "mismatch vs reference"
    print("KERNEL_OK")
</pallas_src>

<mosaic_0001>
module attributes {stable_mosaic.version = 11 : i64} {
  func.func @_attn_kernel(%arg0: i32, %arg1: i32, %arg2: i32, %arg3: memref<1x8x32xf32, #tpu.memory_space<vmem>>, %arg4: memref<1x8x32xf32, #tpu.memory_space<vmem>>, %arg5: memref<1x8x32xf32, #tpu.memory_space<vmem>>, %arg6: memref<1x8x32xf32, #tpu.memory_space<vmem>>, %arg7: memref<8x1xf32, #tpu.memory_space<vmem>>, %arg8: memref<8x1xf32, #tpu.memory_space<vmem>>, %arg9: memref<8x32xf32, #tpu.memory_space<vmem>>) attributes {dimension_semantics = [#tpu.dimension_semantics<parallel>, #tpu.dimension_semantics<parallel>, #tpu.dimension_semantics<arbitrary>], iteration_bounds = array<i64: 4, 1, 1>, scalar_prefetch = 0 : i64, scratch_operands = 3 : i64, tpu.core_type = #tpu.core_type<tc>, window_params = [{transform_indices = @transform_0, window_bounds = array<i64: 1, 8, 32>}, {transform_indices = @transform_1, window_bounds = array<i64: 1, 8, 32>}, {transform_indices = @transform_2, window_bounds = array<i64: 1, 8, 32>}, {transform_indices = @transform_3, window_bounds = array<i64: 1, 8, 32>}]} {
    %c0 = arith.constant 0 : index
    %c0_0 = arith.constant 0 : index
    %c0_1 = arith.constant 0 : index
    %0 = vector.load %arg3[%c0, %c0_0, %c0_1] : memref<1x8x32xf32, #tpu.memory_space<vmem>>, vector<1x8x32xf32>
    %1 = vector.shape_cast %0 : vector<1x8x32xf32> to vector<8x32xf32>
    %cst = arith.constant 0.176776692 : f32
    %2 = vector.broadcast %cst : f32 to vector<8x32xf32>
    %3 = arith.mulf %1, %2 : vector<8x32xf32>
    %c0_2 = arith.constant 0 : index
    %c0_3 = arith.constant 0 : index
    %c0_4 = arith.constant 0 : index
    %4 = vector.load %arg4[%c0_2, %c0_3, %c0_4] : memref<1x8x32xf32, #tpu.memory_space<vmem>>, vector<1x8x32xf32>
    %5 = vector.shape_cast %4 : vector<1x8x32xf32> to vector<8x32xf32>
    %cst_5 = arith.constant dense<0.000000e+00> : vector<8x8xf32>
    %6 = tpu.matmul %3, %5, %cst_5 {dimension_numbers = #tpu.dot_dimension_numbers<[1], [1], [0], [0], [0, 0, 1, 0], [], []>} : vector<8x32xf32>, vector<8x32xf32>, vector<8x8xf32> -> vector<8x8xf32>
    %c0_i32 = arith.constant 0 : i32
    %7 = arith.cmpi eq, %arg2, %c0_i32 : i32
    %8 = arith.extui %7 : i1 to i32
    %c0_i32_6 = arith.constant 0 : i32
    %9 = arith.cmpi ne, %8, %c0_i32_6 : i32
    scf.if %9 {
      %cst_27 = arith.constant 0xFF800000 : f32
      %37 = vector.broadcast %cst_27 : f32 to vector<8x1xf32>
      %c0_28 = arith.constant 0 : index
      %c0_29 = arith.constant 0 : index
      %38 = vector.load %arg7[%c0_28, %c0_29] : memref<8x1xf32, #tpu.memory_space<vmem>>, vector<8x1xf32>
      tpu.vector_store %arg7[%c0_28, %c0_29], %37 {strides = array<i32>} : memref<8x1xf32, #tpu.memory_space<vmem>>, vector<8x1xf32>,
      %cst_30 = arith.constant 0.000000e+00 : f32
      %39 = vector.broadcast %cst_30 : f32 to vector<8x1xf32>
      %c0_31 = arith.constant 0 : index
      %c0_32 = arith.constant 0 : index
      %40 = vector.load %arg8[%c0_31, %c0_32] : memref<8x1xf32, #tpu.memory_space<vmem>>, vector<8x1xf32>
      tpu.vector_store %arg8[%c0_31, %c0_32], %39 {strides = array<i32>} : memref<8x1xf32, #tpu.memory_space<vmem>>, vector<8x1xf32>,
      %cst_33 = arith.constant 0.000000e+00 : f32
      %41 = vector.broadcast %cst_33 : f32 to vector<8x32xf32>
      %c0_34 = arith.constant 0 : index
      %c0_35 = arith.constant 0 : index
      %42 = vector.load %arg9[%c0_34, %c0_35] : memref<8x32xf32, #tpu.memory_space<vmem>>, vector<8x32xf32>
      tpu.vector_store %arg9[%c0_34, %c0_35], %41 {strides = array<i32>} : memref<8x32xf32, #tpu.memory_space<vmem>>, vector<8x32xf32>,
    } else {
    }
    %c0_7 = arith.constant 0 : index
    %c0_8 = arith.constant 0 : index
    %10 = vector.load %arg7[%c0_7, %c0_8] : memref<8x1xf32, #tpu.memory_space<vmem>>, vector<8x1xf32>
    %cst_9 = arith.constant dense<0xFF800000> : vector<8xf32>
    %11 = vector.multi_reduction <maximumf>, %6, %cst_9 [1] : vector<8x8xf32> to vector<8xf32>
    %12 = vector.shape_cast %11 : vector<8xf32> to vector<8x1xf32>
    %13 = arith.maximumf %10, %12 : vector<8x1xf32>
    %14 = arith.subf %10, %13 : vector<8x1xf32>
    %15 = math.exp %14 : vector<8x1xf32>
    %16 = vector.broadcast %13 : vector<8x1xf32> to vector<8x8xf32>
    %17 = arith.subf %6, %16 : vector<8x8xf32>
    %18 = math.exp %17 : vector<8x8xf32>
    %c0_10 = arith.constant 0 : index
    %c0_11 = arith.constant 0 : index
    %19 = vector.load %arg8[%c0_10, %c0_11] : memref<8x1xf32, #tpu.memory_space<vmem>>, vector<8x1xf32>
    %20 = arith.mulf %15, %19 : vector<8x1xf32>
    %cst_12 = arith.constant dense<0.000000e+00> : vector<8xf32>
    %21 = vector.multi_reduction <add>, %18, %cst_12 [1] : vector<8x8xf32> to vector<8xf32>
    %22 = vector.shape_cast %21 : vector<8xf32> to vector<8x1xf32>
    %23 = arith.addf %20, %22 : vector<8x1xf32>
    %c0_13 = arith.constant 0 : index
    %c0_14 = arith.constant 0 : index
    %24 = vector.load %arg8[%c0_13, %c0_14] : memref<8x1xf32, #tpu.memory_space<vmem>>, vector<8x1xf32>
    tpu.vector_store %arg8[%c0_13, %c0_14], %23 {strides = array<i32>} : memref<8x1xf32, #tpu.memory_space<vmem>>, vector<8x1xf32>,
    %c0_15 = arith.constant 0 : index
    %c0_16 = arith.constant 0 : index
    %25 = vector.load %arg9[%c0_15, %c0_16] : memref<8x32xf32, #tpu.memory_space<vmem>>, vector<8x32xf32>
    %26 = vector.broadcast %15 : vector<8x1xf32> to vector<8x32xf32>
    %27 = arith.mulf %26, %25 : vector<8x32xf32>
    %c0_17 = arith.constant 0 : index
    %c0_18 = arith.constant 0 : index
    %c0_19 = arith.constant 0 : index
    %28 = vector.load %arg5[%c0_17, %c0_18, %c0_19] : memref<1x8x32xf32, #tpu.memory_space<vmem>>, vector<1x8x32xf32>
    %29 = vector.shape_cast %28 : vector<1x8x32xf32> to vector<8x32xf32>
    %cst_20 = arith.constant dense<0.000000e+00> : vector<8x32xf32>
    %30 = tpu.matmul %18, %29, %cst_20 {dimension_numbers = #tpu.dot_dimension_numbers<[1], [0], [0], [1], [0, 0, 1, 1], [], []>} : vector<8x8xf32>, vector<8x32xf32>, vector<8x32xf32> -> vector<8x32xf32>
    %31 = arith.addf %27, %30 : vector<8x32xf32>
    %c0_21 = arith.constant 0 : index
    %c0_22 = arith.constant 0 : index
    %32 = vector.load %arg9[%c0_21, %c0_22] : memref<8x32xf32, #tpu.memory_space<vmem>>, vector<8x32xf32>
    tpu.vector_store %arg9[%c0_21, %c0_22], %31 {strides = array<i32>} : memref<8x32xf32, #tpu.memory_space<vmem>>, vector<8x32xf32>,
    %c0_23 = arith.constant 0 : index
    %c0_24 = arith.constant 0 : index
    %33 = vector.load %arg7[%c0_23, %c0_24] : memref<8x1xf32, #tpu.memory_space<vmem>>, vector<8x1xf32>
    tpu.vector_store %arg7[%c0_23, %c0_24], %13 {strides = array<i32>} : memref<8x1xf32, #tpu.memory_space<vmem>>, vector<8x1xf32>,
    %c0_i32_25 = arith.constant 0 : i32
    %34 = arith.cmpi eq, %arg2, %c0_i32_25 : i32
    %35 = arith.extui %34 : i1 to i32
    %c0_i32_26 = arith.constant 0 : i32
    %36 = arith.cmpi ne, %35, %c0_i32_26 : i32
    scf.if %36 {
      %c0_27 = arith.constant 0 : index
      %c0_28 = arith.constant 0 : index
      %37 = vector.load %arg8[%c0_27, %c0_28] : memref<8x1xf32, #tpu.memory_space<vmem>>, vector<8x1xf32>
      %cst_29 = arith.constant 1.000000e+00 : f32
      %38 = vector.broadcast %cst_29 : f32 to vector<8x1xf32>
      %39 = arith.divf %38, %37 : vector<8x1xf32>
      %c0_30 = arith.constant 0 : index
      %c0_31 = arith.constant 0 : index
      %40 = vector.load %arg9[%c0_30, %c0_31] : memref<8x32xf32, #tpu.memory_space<vmem>>, vector<8x32xf32>
      %41 = vector.broadcast %39 : vector<8x1xf32> to vector<8x32xf32>
      %42 = arith.mulf %40, %41 : vector<8x32xf32>
      %c0_32 = arith.constant 0 : index
      %c0_33 = arith.constant 0 : index
      %c0_34 = arith.constant 0 : index
      %43 = vector.load %arg6[%c0_32, %c0_33, %c0_34] : memref<1x8x32xf32, #tpu.memory_space<vmem>>, vector<1x8x32xf32>
      %44 = vector.shape_cast %43 : vector<1x8x32xf32> to vector<8x32xf32>
      %45 = vector.shape_cast %42 : vector<8x32xf32> to vector<1x8x32xf32>
      tpu.vector_store %arg6[%c0_32, %c0_33, %c0_34], %45 {strides = array<i32>} : memref<1x8x32xf32, #tpu.memory_space<vmem>>, vector<1x8x32xf32>,
    } else {
    }
    return
  }
  func.func @transform_0(%arg0: i32, %arg1: i32, %arg2: i32) -> (i32, i32, i32) {
    %c0_i32 = arith.constant 0 : i32
    %c0_i32_0 = arith.constant 0 : i32
    return %arg0, %arg1, %c0_i32 : i32, i32, i32
  }
  func.func @transform_1(%arg0: i32, %arg1: i32, %arg2: i32) -> (i32, i32, i32) {
    %c0_i32 = arith.constant 0 : i32
    %c0_i32_0 = arith.constant 0 : i32
    return %arg0, %arg2, %c0_i32 : i32, i32, i32
  }
  func.func @transform_2(%arg0: i32, %arg1: i32, %arg2: i32) -> (i32, i32, i32) {
    %c0_i32 = arith.constant 0 : i32
    %c0_i32_0 = arith.constant 0 : i32
    return %arg0, %arg2, %c0_i32 : i32, i32, i32
  }
  func.func @transform_3(%arg0: i32, %arg1: i32, %arg2: i32) -> (i32, i32, i32) {
    %c0_i32 = arith.constant 0 : i32
    %c0_i32_0 = arith.constant 0 : i32
    return %arg0, %arg1, %c0_i32 : i32, i32, i32
  }
}

</mosaic_0001>

<bundles_post_ra>
// kernel: tpu_custom_call.1
= control target key start
LH: loop header
LB: loop body
LE: loop exit
PB: predicated region body
PF: predicated region fallthrough
CT: control target
= control target key end

     0   :  { %s1167_s0 = inlined_call_operand.hbm [shape: f32[4,8,32], index: 0, kind: input, shape index: {}]   ;;  %s1168_s1 = inlined_call_operand.hbm [shape: f32[4,8,32], index: 1, kind: input, shape index: {}]   ;;  %s1169_s2 = inlined_call_operand.hbm [shape: f32[4,8,32], index: 2, kind: input, shape index: {}]   ;;  %s1170_s3 = inlined_call_operand.hbm [shape: f32[4,8,32], index: 3, kind: output, shape index: {}]  }
   0x1   :  { %1174 = sst [smem:[#allocation17_spill]] %s1168_s1 }
   0x2   :  { %8 = vsyncpa [#allocation6], 0 }
   0x3   :  { %10 = vsyncpa [#allocation6 + $0x1], 0 }
   0x4   :  { %11 = vsyncpa [#allocation9], 0 }
   0x5   :  { %13 = vsyncpa [#allocation9 + $0x1], 0 }
   0x6   :  { %14 = vsyncpa [#allocation7], 0 }
   0x7   :  { %16 = vsyncpa [#allocation7 + $0x1], 0  ;;  %s959_s12 = smov 0   ;;  %s961_s13 = smov 0  }
   0x8   :  { %s963_s14 = smov 0   ;;  %s965_s15 = smov 0  }
   0x9   :  { %s967_s16 = smov 0   ;;  %s969_s17 = smov 0  }
   0xa LB: > { %1175 = sst [smem:[#allocation15_spill]] %s925_s16  ;;  %s990_s18 = sadd.s32 4294967295, %s929_s17   ;;  %s929_s17 = sphi %s969_s17, %s22_s17   ;;  %s925_s16 = sphi %s967_s16, %s1186_s16   ;;  %s921_s15 = sphi %s965_s15, %s1185_s15   ;;  %s917_s14 = sphi %s963_s14, %s1189_s14   ;;  %s913_s13 = sphi %s961_s13, %s1188_s13   ;;  %s909_s12 = sphi %s959_s12, %s1187_s12  }
   0xb   : > { %s642_s19 = sadd.s32 4294967294, %s929_s17   ;;  %s41_s20 = sadd.s32 1, %s925_s16 }
   0xc   : > { %s50_s21 = sadd.s32 1, %s917_s14  ;;  %p43_p0 = scmp.ge.s32.totalorder %s41_s20, 4 }
   0xd   : > { %p57_p1 = scmp.ne.s32.totalorder %s917_s14, %s913_s13  ;;  %p58_p2 = scmp.eq.s32.totalorder %s929_s17, 0 }
   0xe   : > { %p63_p3 = scmp.ne.s32.totalorder %s913_s13, %s909_s12  ;;  %s1191_s20 = smov (%p43_p0, %s41_s20), 0 }
   0xf   : > { %1176 = sst [smem:[#allocation16_spill]] %s1191_s20  ;;  %p1002_p4 = por %p58_p2, %p57_p1 }
  0x10   : > { %p64_p5 = scmp.eq.s32.totalorder %s990_s18, 0  ;;  %s45_s23 = ssub.s32 %s925_s16, %s1191_s20 }
  0x11   : > { %p145_p6 = scmp.eq.s32.totalorder %s990_s18, 3  ;;  %p48_p7 = scmp.eq.s32.totalorder %s45_s23, 0 }
  0x12   : > { %p1010_p8 = por %p64_p5, %p63_p3  ;;  %p151_p10 = scmp.eq.s32.totalorder %s642_s19, 3 }
  0x13   : > { %p1014_p9 = por %p145_p6, %p57_p1  ;;  %p699_p12 = scmp.lt.s32.totalorder %s929_s17, 4 }
  0x14   : > { %s1019_s26 = scalar_select %p48_p7, %s917_s14, %s50_s21  }
  0x15   : > { %p1021_p11 = por %p151_p10, %p63_p3  ;;  %s1171_s28 = sand.u32 1, %s917_s14  }
  0x16   : > { %s1029_s29 = sshll.u32 %s1171_s28, 3  ;;  %s1032_s30 = sshll.u32 %s925_s16, 7 }
  0x17   : > { %p1036_p13 = pnand %p699_p12, %p1002_p4  ;;  %s190_s5 = sand.u32 1, %s929_s17  }
  0x18   : > { %s1182_s1 = sld [smem:[#allocation17_spill]]  ;;  %s194_s9 = scalar_lea.vmem [#allocation8], %s1029_s29 }
  0x19   : > { %s202_s10 = sshll.u32 %s194_s9, 4  ;;  %p651_p0 = scmp.ge.s32.totalorder %s929_s17, 1  ;;  %s203_s10 = int_to_ptr.vmem [resolvable:$true] %s202_s10 }
  0x1a   : > { %p226_p1 = scmp.lt.s32.totalorder %s929_s17, 5  ;;  %s1048_s11 = scalar_lea.sflag [#allocation9], %s190_s5 }
  0x1b   : > { %p763_p2 = pneg %p1036_p13  ;;  %s774_s19 = scalar_lea.vmem %s203_s10, 128 }
  0x1c   : > { %p775_p3 = scmp.ne.s32.totalorder %s203_s10, %s774_s19  ;;  %s931_s21 = smov [#allocation8]  }
  0x1d   : > { %s779_s22 = sshll.u32 %s931_s21, 4  ;;  %s780_s22 = int_to_ptr.vmem [resolvable:$false] %s779_s22 }
  0x1e   : > { %s200_s8 = scalar_lea.hbm %s1182_s1, %s1032_s30  ;;  %p777_p4 = pnand %p775_p3, %p763_p2 }
  0x1f   : > { %s781_s23 = scalar_lea.vmem %s780_s22, 256  ;;  %p782_p6 = scmp.lt.s32.totalorder %s203_s10, %s780_s22 }
  0x20   : > { %p778_p5 = pneg %p777_p4  ;;  %p783_p7 = scmp.lt.s32.totalorder %s781_s23, %s774_s19 }
  0x22   : > { %p784_p10 = por %p783_p7, %p782_p6 }
  0x24   : > { %p785_p12 = pnand %p784_p10, %p778_p5 }
  0x26   : > { %788 = shalt.err (!%p785_p12)
}
  0x27   : > { %691 = dma.hbm_to_vmem [thread:$0]  (!%p1036_p13), %s200_s8, 128, %s203_s10, %s1048_s11  }
  0x28   : > { %p1062_p3 = pnand %p651_p0, %p226_p1  ;;  %s181_s9 = scalar_lea.hbm %s1167_s0, %s1032_s30 }
  0x29   : > { %s175_s19 = scalar_lea.vmem [#allocation5], %s1029_s29  ;;  %s219_s28 = scalar_lea.hbm %s1169_s2, %s1032_s30 }
  0x2a   : > { %s183_s21 = sshll.u32 %s175_s19, 4  ;;  %s1184_s1 = sand.u32 1, %s917_s14   ;;  %s184_s21 = int_to_ptr.vmem [resolvable:$true] %s183_s21 }
  0x2b   : > { %s172_s20 = scalar_lea.sflag [#allocation6], %s1184_s1  ;;  %s802_s8 = scalar_lea.vmem %s184_s21, 128 }
  0x2c   : > { %p803_p4 = scmp.ne.s32.totalorder %s184_s21, %s802_s8  ;;  %s932_s10 = smov [#allocation5]  }
  0x2d   : > { %s807_s16 = sshll.u32 %s932_s10, 4  ;;  %s808_s16 = int_to_ptr.vmem [resolvable:$false] %s807_s16 }
  0x2e   : > { %p805_p0 = pnand %p803_p4, %p763_p2  ;;  %s809_s6 = scalar_lea.vmem %s808_s16, 256 }
  0x2f   : > { %p810_p5 = scmp.lt.s32.totalorder %s184_s21, %s808_s16  ;;  %p811_p6 = scmp.lt.s32.totalorder %s809_s6, %s802_s8 }
  0x30   : > { %p806_p1 = pneg %p805_p0 }
  0x31   : > { %p812_p7 = por %p811_p6, %p810_p5 }
  0x33   : > { %p813_p10 = pnand %p812_p7, %p806_p1 }
  0x35   : > { %816 = shalt.err (!%p813_p10)
}
  0x36   : > { %688 = dma.hbm_to_vmem [thread:$0]  (!%p1036_p13), %s181_s9, 128, %s184_s21, %s172_s20  }
  0x37   : > { %s213_s1 = scalar_lea.vmem [#allocation10], %s1029_s29  ;;  %s933_s22 = smov [#allocation10]  }
  0x38   : > { %s221_s7 = sshll.u32 %s213_s1, 4  ;;  %s835_s16 = sshll.u32 %s933_s22, 4  ;;  %s222_s7 = int_to_ptr.vmem [resolvable:$true] %s221_s7  ;;  %s836_s16 = int_to_ptr.vmem [resolvable:$false] %s835_s16 }
  0x39   : > { %s830_s19 = scalar_lea.vmem %s222_s7, 128  ;;  %s837_s23 = scalar_lea.vmem %s836_s16, 256 }
  0x3a   : > { %p831_p12 = scmp.ne.s32.totalorder %s222_s7, %s830_s19  ;;  %p838_p1 = scmp.lt.s32.totalorder %s222_s7, %s836_s16 }
  0x3b   : > { %p839_p5 = scmp.lt.s32.totalorder %s837_s23, %s830_s19 }
  0x3c   : > { %p833_p4 = pnand %p831_p12, %p763_p2 }
  0x3d   : > { %p840_p6 = por %p839_p5, %p838_p1 }
  0x3e   : > { %p834_p0 = pneg %p833_p4 }
  0x40   : > { %p841_p7 = pnand %p840_p6, %p834_p0 }
  0x42   : > { %844 = shalt.err (!%p841_p7)
}
  0x43   : > { %694 = dma.hbm_to_vmem [thread:$0]  (!%p1036_p13), %s219_s28, 128, %s222_s7, %s1048_s11  }
  0x44   : > { %230 = sbr.rel (%p1062_p3) target bundleno = 861 (0x35d), region = 32  ;;  %s1097_s9 = sand.u32 (!%p1062_p3), 1, %s913_s13  }
  0x45   : > { %s1100_s21 = sshll.u32 (!%p1062_p3), %s1097_s9, 3  ;;  %s233_s4 = scalar_lea.sflag (!%p1062_p3), [#allocation6], %s1097_s9 }
  0x46   : > { %s236_s8 = scalar_lea.vmem (!%p1062_p3), [#allocation5], %s1100_s21 }
  0x49   : > { %896 = dma.done.wait (%p1010_p8), %s233_s4, 128  }
  0x4a   : > { %898 = vsyncadd (%p1010_p8), %s233_s4, 4294967168  ;;  %s241_s28 = sand.u32 1, %s990_s18   ;;  %s245_s11 = scalar_lea.vmem [#allocation8], %s1100_s21 }
  0x4b   : > { %s242_s30 = scalar_lea.sflag [#allocation9], %s241_s28 }
  0x4c   : > { %900 = dma.done.wait (%p1010_p8), %s242_s30, 256  }
  0x4d   : > { %902 = vsyncadd (%p1010_p8), %s242_s30, 4294967040  ;;  %vm290_vm0 = vcmask 261120   ;;  %v934_v0 = vmov 0.0   ;;  %vm935_vm1 = vmmov 0   ;;  %v289_v1 = vld [vmem:[%s245_s11] sm:$0xff]  ;;  %v287_v2 = vld [vmem:[%s236_s8] sm:$0xff] }
  0x4e   : > { %667 = vmatprep.subr.mxu0 %v934_v0  ;;  %374 = vst.msk [vmem:[#allocation4] sm:$0xff] %vm290_vm0, %v934_v0  ;;  %669 = vmatprep.mubr.msk.f32.mxu0 %vm935_vm1, %v934_v0  ;;  %v288_v3 = vmul.f32 0.17677669, %v287_v2  ;;  %vm371_vm2 = vcmask 7168   ;;  %v936_v4 = vmov -inf   ;;  %vm376_vm3 = vcmask 64512  }
  0x4f   : > { %672 = vmatprep.subr.mxu1 %v934_v0  ;;  %674 = vmatprep.mubr.msk.f32.mxu1 %vm935_vm1, %v934_v0  ;;  %372 = vst.msk [vmem:[#allocation2] sm:$0xff] %vm371_vm2, %v936_v4  ;;  %373 = vst.msk [vmem:[#allocation3] sm:$0xff] %vm371_vm2, %v934_v0  ;;  %v937_v8 = vmov 0   ;;  %s254_s18 = scalar_lea.vmem [#allocation10], %s1100_s21  ;;  %s660_s24 = sshll.u32 %s921_s15, 7 }
  0x50   : > { %668 = vmatpush3.xpose.msk.msra.mxu0 %vm290_vm0, %v289_v1  ;;  %753 = vset.pattern.permute.xlu0 %v937_v8  ;;  %v407_v13 = vld [vmem:[%s254_s18] sm:$0xff]  ;;  %s286_s5 = scalar_lea.vmem [#allocation11], %s1100_s21  ;;  %s511_s7 = scalar_lea.hbm %s1170_s3, %s660_s24 }
  0x51   : > { %754 = vset.pattern.permute.xlu1 %v937_v8  ;;  %673 = vmatpush3.msra.mxu1 %v407_v13  ;;  %s513_s10 = sshll.u32 %s286_s5, 4  ;;  %s499_s19 = scalar_lea.sflag [#allocation7], %s1097_s9  ;;  %s514_s10 = int_to_ptr.vmem [resolvable:$true] %s513_s10 }
  0x52   : > { %s845_s22 = scalar_lea.vmem %s514_s10, 128  ;;  %s938_s16 = smov [#allocation11]  }
  0x53   : > { %670 = vmatmul.mubr.msk.f32.vlgmr.msra.gmra.mxu0 %vm290_vm0, %v288_v3  ;;  %p846_p8 = scmp.ne.s32.totalorder %s514_s10, %s845_s22  ;;  %s849_s15 = sshll.u32 %s938_s16, 4  ;;  %s850_s15 = int_to_ptr.vmem [resolvable:$false] %s849_s15 }
  0x54   : > { %s851_s23 = scalar_lea.vmem %s850_s15, 256  ;;  %p852_p3 = scmp.lt.s32.totalorder %s514_s10, %s850_s15 }
  0x55   : > { %v400_v27 = vld [vmem:[#allocation4] sm:$0xff]  ;;  %p847_p13 = pnand %p846_p8, %p1014_p9  ;;  %p853_p10 = scmp.lt.s32.totalorder %s851_s23, %s845_s22 }
  0x56   : > { %v375_v9 = vld [vmem:[#allocation2] sm:$0xff]  ;;  %v392_v21 = vld [vmem:[#allocation3] sm:$0xff] }
  0x57   : > { %p848_p2 = pneg %p847_p13  ;;  %p854_p12 = por %p853_p10, %p852_p3 }
  0x59   : > { %p855_p4 = pnand %p854_p12, %p848_p2 }
 0x113   : > { %v363_v5 = vpop.f32.mrf.mxu0 }
 0x114   : > { %v377_v6 = vsel %vm376_vm3, %v363_v5, -inf }
 0x115   : > { %378 = vmax.xlane.f32.xlu0 %v377_v6  ;;  %v671_v7 = vpop.f32.mrf.mxu0 }
 0x19e   : > { %v379_v10 = vpop.xlane.xlu0 %378 }
 0x19f   : > { %v380_v11 = vmax.f32 %v375_v9, %v379_v10 }
 0x1a1   : > { %v381_v12 = vsub.f32 %v375_v9, %v380_v11  ;;  %483 = vst.msk [vmem:[#allocation2] sm:$0xff] %vm371_vm2, %v380_v11  ;;  %386 = vperm.xlu0 %753, %v380_v11  }
 0x1a3   : > { %v382_v18 = vmul.f32 1.442695, %v381_v12 }
 0x21c   : > { %v387_v14 = vpop.permute.xlu0 %386 }
 0x21d   : > { %v389_v15 = vsub.f32 %v363_v5, %v387_v14 }
 0x21f   : > { %v390_v16 = vmul.f32 1.442695, %v389_v15 }
 0x221   : > { %755 = vpow2.f32 %v390_v16 }
 0x222   : > { %757 = vpow2.f32 %v382_v18 }
 0x22e   : > { %v756_v17 = vpop.eup %755 }
 0x22f   : > { %675 = vmatmul.mubr.msk.f32.vlgmr.msra.gmra.mxu1 %vm376_vm3, %v756_v17  ;;  %v394_v19 = vsel %vm376_vm3, %v756_v17, 0.0  ;;  %v758_v20 = vpop.eup %757 }
 0x230   : > { %395 = vadd.xlane.f32.xlu1 %v394_v19  ;;  %v393_v22 = vmul.f32 %v758_v20, %v392_v21 }
 0x241   : > { %403 = vperm.xlu1 %754, %v758_v20  }
 0x2b9   : > { %v396_v23 = vpop.xlane.xlu1 %395 }
 0x2ba   : > { %v397_v24 = vadd.f32 %v396_v23, %v393_v22 }
 0x2bc   : > { %399 = vst.msk [vmem:[#allocation3] sm:$0xff] %vm371_vm2, %v397_v24 }
 0x2bd   : > { %v404_v28 = vpop.permute.xlu1 %403 }
 0x2be   : > { %v406_v29 = vmul.f32 %v404_v28, %v400_v27 }
 0x2c3   : > { %v487_v25 = vld [vmem:[#allocation3] sm:$0xff] }
 0x2c4   : > { %759 = vrcp.f32 %v487_v25 }
 0x2d1   : > { %v760_v26 = vpop.eup %759 }
 0x2d2   : > { %493 = vperm.xlu1 %754, %v760_v26  }
 0x2ef   : > { %v477_v30 = vpop.f32.mrf.mxu1 }
 0x2f0   : > { %v481_v31 = vadd.f32 %v477_v30, %v406_v29 }
 0x2f1   : > { %v676_v32 = vpop.f32.mrf.mxu1 }
 0x2f2   : > { %482 = vst.msk [vmem:[#allocation4] sm:$0xff] %vm290_vm0, %v481_v31 }
 0x2f9   : > { %v490_v33 = vld [vmem:[#allocation4] sm:$0xff] }
 0x34d   : > { %v494_v34 = vpop.permute.xlu1 %493 }
 0x34e   : > { %v496_v35 = vmul.f32 %v494_v34, %v490_v33 }
 0x350   : > { %497 = vst.msk [vmem:[%s286_s5] sm:$0xff] %vm290_vm0, %v496_v35 }
 0x351   : > { %858 = shalt.err (!%p855_p4)
}
 0x352   : > { %s859_s20 = scalar_lea.hbm %s511_s7, 128  ;;  %s863_s21 = scalar_lea.hbm %s1170_s3, 512 }
 0x353   : > { %p860_p0 = scmp.ne.s32.totalorder %s511_s7, %s859_s20  ;;  %p864_p6 = scmp.lt.s32.totalorder %s511_s7, %s1170_s3 }
 0x354   : > { %p865_p7 = scmp.lt.s32.totalorder %s863_s21, %s859_s20 }
 0x355   : > { %p861_p1 = pnand %p860_p0, %p1014_p9 }
 0x356   : > { %p866_p8 = por %p865_p7, %p864_p6 }
 0x357   : > { %p862_p5 = pneg %p861_p1 }
 0x359   : > { %p867_p13 = pnand %p866_p8, %p862_p5 }
 0x35b   : > { %870 = shalt.err (!%p867_p13)
}
 0x35c   : > { %683 = dma.vmem_to_hbm [thread:$0]  (%p1014_p9), %s514_s10, 128, %s511_s7, %s499_s19  }
 0x35d PF: > { %p700_p2 = scmp.ge.s32.totalorder %s929_s17, 2  ;;  %s525_s28 = sand.u32 1, %s909_s12  }
 0x35e   : > { %s526_s30 = scalar_lea.sflag [#allocation7], %s525_s28 }
 0x35f   : > { %p696_p3 = pnand %p700_p2, %p1021_p11 }
 0x361   : > { %p697_p10 = pneg %p696_p3 }
 0x363   : > { %904 = dma.done.wait (%p697_p10), %s526_s30, 128  }
 0x364   : > { %906 = vsyncadd (%p697_p10), %s526_s30, 4294967168  ;;  %s22_s17 = sadd.s32 1, %s929_s17   ;;  %s1185_s15 = sld [smem:[#allocation15_spill]] }
 0x365   : > { %p19_p12 = scmp.ge.s32.totalorder %s22_s17, 6   ;;  %s1186_s16 = sld [smem:[#allocation16_spill]] }
 0x366   : > { %s1187_s12 = smov %s913_s13  ;;  %s1188_s13 = smov %s917_s14 }
 0x367   : > { %s1189_s14 = smov %s1019_s26  ;;  %21 = sbr.rel (!%p19_p12) target bundleno = 10 (0xa), region = 109 }
 0x36c   :  { %531 = vsyncpa [#allocation6], 1 }
 0x36d   :  { %533 = vsyncpa [#allocation6 + $0x1], 1 }
 0x36e   :  { %534 = vsyncpa [#allocation9], 1 }
 0x36f   :  { %536 = vsyncpa [#allocation9 + $0x1], 1 }
 0x370   :  { %537 = vsyncpa [#allocation7], 1 }
 0x371   :  { %539 = vsyncpa [#allocation7 + $0x1], 1 }

</bundles_post_ra>
